<compile_context>
chip_gen: v7x
topology: tpu7x:2x2x1
jax: 0.10.0
libtpu: 0.0.40
codegen_flags: <defaults>
</compile_context>

<pallas_src>
import jax
import jax.numpy as jnp
from jax.experimental import pallas as pl
from jax.experimental.pallas import tpu as pltpu


def _round_up(x, m):
    return ((x + m - 1) // m) * m


def _cdiv(a, b):
    return (a + b - 1) // b


def _sublane_multiple(dtype):
    # Sub-32-bit dtypes pack along sublanes: 8 rows f32, 16 bf16, 32 int8/fp8.
    return {4: 8, 2: 16, 1: 32}.get(jnp.dtype(dtype).itemsize, 8)


def _choose_tm(M, sub):
    """M-tile: multiple of `sub`, >= 2 tiles when possible, minimal padding waste."""
    if M <= sub:
        return _round_up(M, sub)
    if M <= 1024:
        # Split roughly in half (>= 2 tiles for megacore), rounded to sublanes.
        return min(512, _round_up(_cdiv(M, 2), sub))
    # Large M: pick the candidate that minimizes the padded tail; prefer larger tiles.
    cands = [c for c in (512, 384, 256, 128) if c % sub == 0]
    return min(cands, key=lambda c: (_round_up(M, c) - M, -c))


def _patch_embed_kernel(x_ref, w_ref, b_ref, o_ref):
    # x_ref: (tm, K), w_ref: (K, tn), b_ref: (1, tn) f32, o_ref: (tm, tn).
    # Single MXU matmul with f32 accumulation; bias add + cast in the f32 epilogue.
    acc = jnp.dot(x_ref[...], w_ref[...], preferred_element_type=jnp.float32)
    o_ref[...] = (acc + b_ref[...]).astype(o_ref.dtype)


def _patch_embed_impl(x, weight, bias, *, patch_size, compute_dtype=None):
    """x: (B, C, H, W) NCHW.  weight: (D, C, p, p) (PyTorch Conv2d OIHW).  bias: (D,).
    Returns (B, L, D) with L = (H//p) * (W//p)."""
    B, C, H, W = x.shape
    D = weight.shape[0]
    p = patch_size
    assert H % p == 0 and W % p == 0
    Hp, Wp = H // p, W // p
    L = Hp * Wp
    K = C * p * p
    M = B * L

    in_dtype = x.dtype
    if compute_dtype is None:
        # bf16 is MXU-native on every generation and halves HBM traffic; accumulation
        # stays f32.  Pass compute_dtype=jnp.float32 for bit-closer f32-conv parity.
        compute_dtype = jnp.bfloat16 if in_dtype == jnp.float32 else in_dtype
    cdtype = jnp.dtype(compute_dtype)
    csize = cdtype.itemsize
    osize = jnp.dtype(in_dtype).itemsize
    sub = _sublane_multiple(cdtype)

    # ---- tiling ---------------------------------------------------------------
    Dpad = _round_up(D, 128)            # lane-dense output columns (full `vst`)
    tm = _choose_tm(M, sub)
    Mpad = _round_up(M, tm)
    # Weight residency: keep the whole (K, Dpad) weight + bias in VMEM when it fits
    # (always true for ViT-sized patch embeddings) so it is DMA'd exactly once.
    if 2 * K * Dpad * csize <= (12 << 20):
        tn = Dpad
    else:  # pathological huge-D fallback: tile D as well
        tn = 512 if Dpad % 512 == 0 else (256 if Dpad % 256 == 0 else 128)
    grid = (Mpad // tm, Dpad // tn)

    # ---- im2col: one fused cast+transpose(+pad) copy under jit -----------------
    # Per-patch feature order (c, kh, kw) matches the flattened OIHW weight rows.
    patches = x.astype(cdtype).reshape(B, C, Hp, p, Wp, p)
    patches = patches.transpose(0, 2, 4, 1, 3, 5).reshape(M, K)
    if Mpad != M:
        patches = jnp.pad(patches, ((0, Mpad - M), (0, 0)))

    # Weight is tiny; host-side reshape/transpose/pad is negligible.
    w2d = weight.reshape(D, K).T.astype(cdtype)      # (K, D)
    b2d = bias.reshape(1, D).astype(jnp.float32)     # (1, D), f32 epilogue add
    if Dpad != D:
        w2d = jnp.pad(w2d, ((0, 0), (0, Dpad - D)))
        b2d = jnp.pad(b2d, ((0, 0), (0, Dpad - D)))

    # ---- explicit VMEM budget (v7x only has 64 MiB physical) -------------------
    vmem_need = (2 * tm * K * csize        # streaming activation tile (double-buffered)
                 + 2 * K * tn * csize      # weight block (resident when tn == Dpad)
                 + 2 * tn * 4              # bias
                 + 2 * tm * tn * osize)    # output tile (double-buffered)
    vmem_limit = int(min(max(vmem_need + (vmem_need >> 2) + (2 << 20), 16 << 20),
                         64 << 20))

    weight_bytes = K * Dpad * csize * (1 if grid[1] == 1 else grid[0])
    cost = pl.CostEstimate(
        flops=2 * Mpad * K * Dpad,
        transcendentals=0,
        bytes_accessed=(Mpad * K * csize + weight_bytes + Dpad * 4
                        + Mpad * Dpad * osize))

    out = pl.pallas_call(
        _patch_embed_kernel,
        out_shape=jax.ShapeDtypeStruct((Mpad, Dpad), in_dtype),
        grid=grid,
        in_specs=[
            # Activations: new M-tile only when i changes (j is the inner axis and the
            # block index is independent of j, so no re-fetch across j).  If a trace
            # shows exposed DMA on v6e, bump this spec to pipeline_mode=pl.Buffered(3).
            pl.BlockSpec((tm, K), lambda i, j: (i, 0)),
            # Weight / bias: with grid[1] == 1 the block index is constant, so they are
            # DMA'd once and stay resident in VMEM for the whole kernel.
            pl.BlockSpec((K, tn), lambda i, j: (0, j)),
            pl.BlockSpec((1, tn), lambda i, j: (0, j)),
        ],
        out_specs=pl.BlockSpec((tm, tn), lambda i, j: (i, j)),
        compiler_params=pltpu.CompilerParams(
            # Independent output tiles on both axes; "parallel" on the M axis lets v7x
            # megacore shard the (>= 2) M-tiles across both TensorCores.
            dimension_semantics=("parallel", "parallel"),
            vmem_limit_bytes=vmem_limit,
        ),
        cost_estimate=cost,
    )(patches, w2d, b2d)

    # Strip padding and restore (B, L, D).
    return out[:M, :D].reshape(B, L, D)


patch_embed = jax.jit(
    _patch_embed_impl, static_argnames=("patch_size", "compute_dtype"))


if __name__ == "__main__":
    # Small shapes consistent with the module: B=2, C=4, H=W=16, patch=4, D=32.
    B, C, H, W = 2, 4, 16, 16
    patch_size = 4
    embed_dim = 32

    key = jax.random.PRNGKey(0)
    kx, kw, kb = jax.random.split(key, 3)

    x = jax.random.normal(kx, (B, C, H, W), dtype=jnp.float32)
    # Deterministic synthetic Conv2d parameters (PyTorch layout: (D, C, p, p)).
    weight = jax.random.normal(
        kw, (embed_dim, C, patch_size, patch_size), dtype=jnp.float32) * 0.02
    bias = jax.random.normal(kb, (embed_dim,), dtype=jnp.float32) * 0.02

    L = (H // patch_size) * (W // patch_size)

    # Reference: plain XLA conv (same semantics as nn.Conv2d + flatten(2).transpose(1,2)).
    ref = jax.lax.conv_general_dilated(
        x, weight, window_strides=(patch_size, patch_size), padding="VALID",
        dimension_numbers=("NCHW", "OIHW", "NCHW"))
    ref = ref + bias.reshape(1, embed_dim, 1, 1)
    ref = ref.reshape(B, embed_dim, L).transpose(0, 2, 1)  # (B, L, D)

    # Default path: bf16 MXU compute with f32 accumulation (recommended on v6e/v7x).
    out_bf16 = jax.block_until_ready(
        patch_embed(x, weight, bias, patch_size=patch_size))
    assert out_bf16.shape == (B, L, embed_dim)
    assert out_bf16.dtype == x.dtype
    assert jnp.allclose(out_bf16, ref, atol=5e-2, rtol=5e-2)

    # Full-f32 compute path (exact module semantics, default MXU precision).
    out_f32 = jax.block_until_ready(
        patch_embed(x, weight, bias, patch_size=patch_size,
                    compute_dtype=jnp.float32))
    assert out_f32.shape == (B, L, embed_dim)
    assert jnp.allclose(out_f32, ref, atol=5e-3, rtol=5e-3)

    print("KERNEL_OK")
</pallas_src>

<mosaic_0001>
module attributes {stable_mosaic.version = 11 : i64} {
  func.func @_patch_embed_kernel(%arg0: i32, %arg1: i32, %arg2: memref<16x64xbf16, #tpu.memory_space<vmem>>, %arg3: memref<64x128xbf16, #tpu.memory_space<vmem>>, %arg4: memref<1x128xf32, #tpu.memory_space<vmem>>, %arg5: memref<16x128xf32, #tpu.memory_space<vmem>>) attributes {dimension_semantics = [#tpu.dimension_semantics<parallel>, #tpu.dimension_semantics<parallel>], iteration_bounds = array<i64: 2, 1>, scalar_prefetch = 0 : i64, scratch_operands = 0 : i64, tpu.core_type = #tpu.core_type<tc>, window_params = [{transform_indices = @transform_0, window_bounds = array<i64: 16, 64>}, {transform_indices = @transform_1, window_bounds = array<i64: 64, 128>}, {transform_indices = @transform_2, window_bounds = array<i64: 1, 128>}, {transform_indices = @transform_3, window_bounds = array<i64: 16, 128>}]} {
    %c0 = arith.constant 0 : index
    %c0_0 = arith.constant 0 : index
    %0 = vector.load %arg2[%c0, %c0_0] : memref<16x64xbf16, #tpu.memory_space<vmem>>, vector<16x64xbf16>
    %c0_1 = arith.constant 0 : index
    %c0_2 = arith.constant 0 : index
    %1 = vector.load %arg3[%c0_1, %c0_2] : memref<64x128xbf16, #tpu.memory_space<vmem>>, vector<64x128xbf16>
    %cst = arith.constant dense<0.000000e+00> : vector<16x128xf32>
    %2 = tpu.matmul %0, %1, %cst {dimension_numbers = #tpu.dot_dimension_numbers<[1], [0], [0], [1], [0, 0, 1, 1], [], []>} : vector<16x64xbf16>, vector<64x128xbf16>, vector<16x128xf32> -> vector<16x128xf32>
    %c0_3 = arith.constant 0 : index
    %c0_4 = arith.constant 0 : index
    %3 = vector.load %arg4[%c0_3, %c0_4] : memref<1x128xf32, #tpu.memory_space<vmem>>, vector<1x128xf32>
    %4 = vector.broadcast %3 : vector<1x128xf32> to vector<16x128xf32>
    %5 = arith.addf %2, %4 : vector<16x128xf32>
    %c0_5 = arith.constant 0 : index
    %c0_6 = arith.constant 0 : index
    %6 = vector.load %arg5[%c0_5, %c0_6] : memref<16x128xf32, #tpu.memory_space<vmem>>, vector<16x128xf32>
    tpu.vector_store %arg5[%c0_5, %c0_6], %5 {strides = array<i32>} : memref<16x128xf32, #tpu.memory_space<vmem>>, vector<16x128xf32>,
    return
  }
  func.func @transform_0(%arg0: i32, %arg1: i32) -> (i32, i32) {
    %c0_i32 = arith.constant 0 : i32
    %c0_i32_0 = arith.constant 0 : i32
    return %arg0, %c0_i32 : i32, i32
  }
  func.func @transform_1(%arg0: i32, %arg1: i32) -> (i32, i32) {
    %c0_i32 = arith.constant 0 : i32
    %c0_i32_0 = arith.constant 0 : i32
    return %c0_i32, %arg1 : i32, i32
  }
  func.func @transform_2(%arg0: i32, %arg1: i32) -> (i32, i32) {
    %c0_i32 = arith.constant 0 : i32
    %c0_i32_0 = arith.constant 0 : i32
    return %c0_i32, %arg1 : i32, i32
  }
  func.func @transform_3(%arg0: i32, %arg1: i32) -> (i32, i32) {
    %c0_i32 = arith.constant 0 : i32
    return %arg0, %arg1 : i32, i32
  }
}

</mosaic_0001>

<bundles_post_ra>
// kernel: _patch_embed_impl.1
= control target key start
LH: loop header
LB: loop body
LE: loop exit
PB: predicated region body
PF: predicated region fallthrough
CT: control target
= control target key end

     0   :  { %8 = vsyncpa [#allocation3], 0  ;;  %s763_s0 = inlined_call_operand.vmem [shape: bf16[32,64], index: 0, kind: input, shape index: {}]   ;;  %s764_s1 = inlined_call_operand.vmem [shape: bf16[64,128], index: 1, kind: input, shape index: {}]   ;;  %s765_s2 = inlined_call_operand.vmem [shape: f32[1,128], index: 2, kind: input, shape index: {}]   ;;  %s766_s3 = inlined_call_operand.hbm [shape: f32[32,128], index: 3, kind: output, shape index: {}]  }
   0x1   :  { %10 = vsyncpa [#allocation3 + $0x1], 0  ;;  %s634_s12 = smov 0   ;;  %s636_s13 = smov 0  }
   0x2   :  { %s638_s14 = smov 0   ;;  %s640_s15 = smov 0  }
   0x3   :  { %s642_s16 = smov 0   ;;  %s644_s17 = smov 0  }
   0x4 LB: > { %s425_s18 = sadd.s32 4294967295, %s607_s17   ;;  %s426_s19 = sadd.s32 4294967294, %s607_s17   ;;  %s607_s17 = sphi %s644_s17, %s16_s17   ;;  %s603_s16 = sphi %s642_s16, %s773_s16   ;;  %s599_s15 = sphi %s640_s15, %s772_s15   ;;  %s595_s14 = sphi %s638_s14, %s771_s14   ;;  %s591_s13 = sphi %s636_s13, %s770_s13   ;;  %s587_s12 = sphi %s634_s12, %s769_s12  }
   0x5   : > { %s28_s20 = sadd.s32 1, %s603_s16  ;;  %s115_s21 = sadd.s32 1, %s595_s14 }
   0x6   : > { %p30_p0 = scmp.ge.s32.totalorder %s28_s20, 2  ;;  %p125_p1 = scmp.ne.s32.totalorder %s595_s14, %s591_s13 }
   0x7   : > { %p126_p2 = scmp.eq.s32.totalorder %s425_s18, 1  ;;  %p131_p3 = scmp.ne.s32.totalorder %s591_s13, %s587_s12 }
   0x8   : > { %s775_s20 = smov (%p30_p0, %s28_s20), 0  ;;  %p132_p5 = scmp.eq.s32.totalorder %s426_s19, 1 }
   0x9   : > { %p674_p4 = por %p126_p2, %p125_p1  ;;  %s110_s23 = ssub.s32 %s603_s16, %s775_s20 }
   0xa   : > { %p431_p6 = scmp.ge.s32.totalorder %s607_s17, 1  ;;  %p113_p7 = scmp.eq.s32.totalorder %s110_s23, 0 }
   0xb   : > { %p681_p8 = por %p132_p5, %p131_p3  ;;  %p172_p9 = scmp.lt.s32.totalorder %s607_s17, 3 }
   0xc   : > { %s687_s25 = scalar_select %p113_p7, %s595_s14, %s115_s21  }
   0xd   : > { %p173_p10 = pnand %p431_p6, %p172_p9 }
   0xe   : > { %v524_v0 = vld [vmem:[%s764_s1] sm:$0xff] (!%p173_p10)   ;;  %v609_v1 = vmov (!%p173_p10), 0.0   ;;  %v525_v2 = vld [vmem:[%s764_s1 + $0x8] sm:$0xff] (!%p173_p10)   ;;  %vm610_vm0 = vmmov (!%p173_p10), 0   ;;  %s433_s30 = sshll.u32 (!%p173_p10), %s599_s15, 1  ;;  %v526_v3 = vld [vmem:[%s764_s1 + $0x10] sm:$0xff] (!%p173_p10)  }
   0xf   : > { %176 = sbr.rel (%p173_p10) target bundleno = 262 (0x106), region = 32  ;;  %453 = vmatprep.subr.bf16.mxu0 (!%p173_p10), %v609_v1  ;;  %461 = vmatprep.mubr.msk.bf16.mxu0 (!%p173_p10), %vm610_vm0, %v609_v1  ;;  %p204_p11 = scmp.lt.s32.totalorder (!%p173_p10), %s433_s30, 3  ;;  %v527_v4 = vld [vmem:[%s764_s1 + $0x18] sm:$0xff] (!%p173_p10)   ;;  %vm264_vm1 = vcmask (!%p173_p10), 523264   ;;  %v435_v6 = vld [vmem:[%s765_s2] ss:$0 sm:$0xff] (!%p173_p10) }
  0x10   : > { %454 = vmatpush3.bf16.msra.mxu0 (!%p173_p10), %v524_v0  ;;  %s200_s18 = sand.u32 (!%p173_p10), 1, %s591_s13   ;;  %s447_s28 = sshll.u32 (!%p173_p10), %s599_s15, 8 }
  0x11   : > { %455 = vmatprep.subr.bf16.mxu0 (!%p173_p10), %v609_v1  ;;  %s432_s19 = sshll.u32 (!%p173_p10), %s200_s18, 4  ;;  %s715_s4 = scalar_lea.hbm (!%p173_p10), %s766_s3, %s447_s28 }
  0x12   : > { %s202_s26 = scalar_lea.vmem (!%p173_p10), [#allocation2], %s432_s19  ;;  %s717_s5 = scalar_lea.sflag (!%p173_p10), [#allocation3], %s200_s18 }
  0x13   : > { %s326_s27 = sshll.u32 (!%p173_p10), %s202_s26, 4  ;;  %s710_s27 = int_to_ptr.vmem [resolvable:$true] %s326_s27 }
  0x14   : > { %456 = vmatpush3.bf16.msra.mxu0 (!%p173_p10), %v525_v2  ;;  %s529_s15 = scalar_lea.vmem (!%p173_p10), %s710_s27, 256 }
  0x15   : > { %457 = vmatprep.subr.bf16.mxu0 (!%p173_p10), %v609_v1  ;;  %p530_p12 = scmp.ne.s32.totalorder (!%p173_p10), %s710_s27, %s529_s15 }
  0x16   : > { %s777_s30 = smov (!%p204_p11, %s433_s30), 3 }
  0x17   : > { %s434_s6 = sshll.u32 %s777_s30, 2  ;;  %p531_p13 = pnand %p530_p12, %p674_p4 }
  0x18   : > { %s207_s9 = scalar_lea.vmem %s763_s0, %s434_s6  ;;  %458 = vmatpush3.bf16.msra.mxu0 %v526_v3  ;;  %s611_s6 = smov [#allocation2]  }
  0x19   : > { %459 = vmatprep.subr.bf16.mxu0 %v609_v1  ;;  %v528_v5 = vld [vmem:[%s207_s9] sm:$0xff]   ;;  %p532_p0 = pneg %p531_p13  ;;  %s533_s7 = sshll.u32 %s611_s6, 4  ;;  %s534_s7 = int_to_ptr.vmem [resolvable:$false] %s533_s7 }
  0x1a   : > { %s535_s8 = scalar_lea.vmem %s534_s7, 512  ;;  %p536_p1 = scmp.lt.s32.totalorder %s710_s27, %s534_s7 }
  0x1b   : > { %p537_p2 = scmp.lt.s32.totalorder %s535_s8, %s529_s15 }
  0x1c   : > { %460 = vmatpush3.bf16.msra.mxu0 %v527_v4 }
  0x1d   : > { %p538_p3 = por %p537_p2, %p536_p1 }
  0x1f   : > { %462 = vmatmul.mubr.msk.bf16.vlgmr.msra.gmra.mrb[0].mxu0 %vm264_vm1, %v528_v5  ;;  %p539_p5 = pnand %p538_p3, %p532_p0 }
  0xf2   : > { %v302_v7 = vpop.f32.mrb[0].mxu0 }
  0xf3   : > { %v303_v8 = vadd.f32 %v435_v6, %v302_v7  ;;  %v463_v9 = vpop.f32.mrb[1].mxu0 }
  0xf4   : > { %v305_v10 = vpop.f32.mrb[2].mxu0 }
  0xf5   : > { %309 = vst [vmem:[%s202_s26] sm:$0xff] %v303_v8  ;;  %v306_v11 = vadd.f32 %v435_v6, %v305_v10  ;;  %v464_v12 = vpop.f32.mrb[3].mxu0 }
  0xf7   : > { %310 = vst [vmem:[%s202_s26 + $0x8] sm:$0xff] %v306_v11 }
  0xf8   : > { %542 = shalt.err (!%p539_p5)
}
  0xf9   : > { %s543_s9 = scalar_lea.hbm %s715_s4, 256  ;;  %s547_s18 = scalar_lea.hbm %s766_s3, 512 }
  0xfa   : > { %p544_p6 = scmp.ne.s32.totalorder %s715_s4, %s543_s9  ;;  %p548_p10 = scmp.lt.u32.totalorder %s715_s4, %s766_s3 }
  0xfb   : > { %p549_p11 = scmp.lt.u32.totalorder %s547_s18, %s543_s9  ;;  %p551_p13 = scmp.lt.u32.totalorder %s543_s9, %s715_s4 }
  0xfc   : > { %p545_p7 = pnand %p544_p6, %p674_p4 }
  0xfd   : > { %p550_p12 = por %p549_p11, %p548_p10 }
  0xfe   : > { %p546_p9 = pneg %p545_p7 }
  0xff   : > { %p552_p0 = por %p551_p13, %p550_p12 }
 0x101   : > { %p553_p1 = pnand %p552_p0, %p546_p9 }
 0x103   : > { %556 = shalt.err (!%p553_p1)
}
 0x104   : > { %s612_s23 = smov 128   ;;  %s613_s26 = smov 8  }
 0x105   : > { %465 = dma.vmem_to_hbm [thread:$0]  (%p674_p4), %s710_s27, 256, %s715_s4, %s717_s5, %s612_s23, %s612_s23, %s613_s26  }
 0x106 PF: > { %p471_p2 = scmp.ge.s32.totalorder %s607_s17, 2  ;;  %s341_s28 = sand.u32 1, %s587_s12  }
 0x107   : > { %s342_s29 = scalar_lea.sflag [#allocation3], %s341_s28 }
 0x108   : > { %p468_p3 = pnand %p471_p2, %p681_p8 }
 0x10a   : > { %582 = dma.done.wait (!%p468_p3), %s342_s29, 256  }
 0x10b   : > { %584 = vsyncadd (!%p468_p3), %s342_s29, 4294967040  ;;  %s16_s17 = sadd.s32 1, %s607_s17   ;;  %s769_s12 = smov %s591_s13 }
 0x10c   : > { %p13_p5 = scmp.ge.s32.totalorder %s16_s17, 4   ;;  %s770_s13 = smov %s595_s14 }
 0x10d   : > { %s771_s14 = smov %s687_s25  ;;  %s772_s15 = smov %s603_s16 }
 0x10e   : > { %s773_s16 = smov %s775_s20  ;;  %15 = sbr.rel (!%p13_p5) target bundleno = 4 (0x4), region = 73 }
 0x115   :  { %347 = vsyncpa [#allocation3], 1 }
 0x116   :  { %349 = vsyncpa [#allocation3 + $0x1], 1 }

</bundles_post_ra>
